<compile_context>
chip_gen: v7x
topology: tpu7x:2x2x1
jax: 0.10.0
libtpu: 0.0.40
codegen_flags: <defaults>
</compile_context>

<pallas_src>
import functools

import jax
import jax.numpy as jnp
from jax.experimental import pallas as pl
from jax.experimental.pallas import tpu as pltpu

LANE = 128     # TPU lane width (last-dim tiling unit)
SUBLANE = 8    # f32 sublane width


def _round_up(n, m):
    return ((n + m - 1) // m) * m


def _fused_ae_kernel(x_ref, w_ref, b_ref, embed_ref, out_ref, *, n_enc, n_layers):
    """Fused encoder+decoder: unrolled chain of (MXU dot -> f32 bias -> ReLU).

    x_ref:     (TILE_B, PAD)   bf16  padded input activations
    w_ref:     (L, PAD, PAD)   bf16  all layer weights (grid-invariant, resident)
    b_ref:     (L, 1, PAD)     f32   all layer biases  (grid-invariant, resident)
    embed_ref: (TILE_B, PAD)   f32   padded bottleneck activations
    out_ref:   (TILE_B, PAD)   f32   padded reconstruction
    """
    h = x_ref[...]                                     # bf16 MXU operand
    acc = None
    for l in range(n_layers):                          # static unroll (L is tiny)
        acc = jnp.dot(h, w_ref[l], preferred_element_type=jnp.float32)
        acc = jnp.maximum(acc + b_ref[l], 0.0)         # f32 bias + ReLU (VPU)
        if l == n_enc - 1:
            embed_ref[...] = acc.astype(embed_ref.dtype)
        h = acc.astype(jnp.bfloat16)                   # bf16 for next MXU op
    out_ref[...] = acc.astype(out_ref.dtype)


def fused_autoencoder_forward(x_pad, w_all, b_all, *, n_enc, tile_b):
    """x_pad: (B_pad, PAD) bf16, w_all: (L, PAD, PAD) bf16, b_all: (L, 1, PAD) f32."""
    b_tot, pad = x_pad.shape
    n_layers = w_all.shape[0]
    assert b_tot % tile_b == 0
    grid = (b_tot // tile_b,)

    kernel = functools.partial(_fused_ae_kernel, n_enc=n_enc, n_layers=n_layers)
    embed, out = pl.pallas_call(
        kernel,
        out_shape=(
            jax.ShapeDtypeStruct((b_tot, pad), jnp.float32),   # embed (padded)
            jax.ShapeDtypeStruct((b_tot, pad), jnp.float32),   # out   (padded)
        ),
        grid=grid,
        in_specs=[
            pl.BlockSpec((tile_b, pad), lambda i: (i, 0)),              # x tile
            pl.BlockSpec((n_layers, pad, pad), lambda i: (0, 0, 0)),    # weights, resident
            pl.BlockSpec((n_layers, 1, pad), lambda i: (0, 0, 0)),      # biases, resident
        ],
        out_specs=(
            pl.BlockSpec((tile_b, pad), lambda i: (i, 0)),
            pl.BlockSpec((tile_b, pad), lambda i: (i, 0)),
        ),
        compiler_params=pltpu.CompilerParams(
            dimension_semantics=("parallel",),   # shard batch tiles across TCs (v7x)
        ),
    )(x_pad, w_all, b_all)
    return embed, out


@functools.partial(
    jax.jit,
    static_argnames=("n_enc", "tile_b", "pad", "b_pad", "d_in", "d_embed",
                     "d_out", "batch"),
)
def _forward_padded(x, w_all, b_all, *, n_enc, tile_b, pad, b_pad, d_in,
                    d_embed, d_out, batch):
    """Single jitted graph: pad -> fused pallas_call -> unpad."""
    x_padded = (
        jnp.zeros((b_pad, pad), jnp.float32)
        .at[:batch, :d_in].set(x.astype(jnp.float32))
        .astype(jnp.bfloat16)
    )
    embed_p, out_p = fused_autoencoder_forward(
        x_padded, w_all, b_all, n_enc=n_enc, tile_b=tile_b)
    return embed_p[:batch, :d_embed], out_p[:batch, :d_out]


class BaseAutoencoderPallas:
    """JAX/Pallas equivalent of BaseAutoencoder(layer_type=nn.Linear, activations=ReLU())."""

    def __init__(self, enc_channels, dec_channels, key, tile_b_max=512):
        self.enc_channels = tuple(enc_channels)
        self.dec_channels = tuple(dec_channels)
        if self.enc_channels[-1] != self.dec_channels[0]:
            # mirror the PyTorch warning path: prepend bridging channel
            self.dec_channels = (self.enc_channels[-1],) + self.dec_channels

        dims = list(self.enc_channels) + list(self.dec_channels[1:])
        self.layer_dims = list(zip(dims[:-1], dims[1:]))
        self.n_enc = len(self.enc_channels) - 1
        self.n_layers = len(self.layer_dims)
        self.tile_b_max = tile_b_max
        # pad every feature dim to a lane-dense multiple of 128
        self.pad = _round_up(max(dims), LANE)

        keys = jax.random.split(key, self.n_layers)
        self.params_f32 = []   # logical (in,out) f32 weights + (out,) f32 bias (reference)
        w_stack, b_stack = [], []
        for (din, dout), k in zip(self.layer_dims, keys):
            kw, kb = jax.random.split(k)
            bound = 1.0 / float(din) ** 0.5
            # PyTorch nn.Linear default init: uniform(-1/sqrt(in), 1/sqrt(in))
            w_t = jax.random.uniform(kw, (din, dout), jnp.float32,
                                     minval=-bound, maxval=bound)
            b = jax.random.uniform(kb, (dout,), jnp.float32,
                                   minval=-bound, maxval=bound)
            self.params_f32.append((w_t, b))
            w_pad = jnp.zeros((self.pad, self.pad), jnp.float32).at[:din, :dout].set(w_t)
            b_pad = jnp.zeros((1, self.pad), jnp.float32).at[0, :dout].set(b)
            w_stack.append(w_pad)
            b_stack.append(b_pad)
        self.w_all = jnp.stack(w_stack).astype(jnp.bfloat16)   # (L, PAD, PAD) bf16
        self.b_all = jnp.stack(b_stack)                        # (L, 1, PAD)  f32

    def __call__(self, x, return_embed=False):
        B, din = x.shape
        assert din == self.enc_channels[0]

        tile_b = min(self.tile_b_max, _round_up(B, SUBLANE))
        b_pad = _round_up(B, tile_b)

        embed, out = _forward_padded(
            x, self.w_all, self.b_all,
            n_enc=self.n_enc, tile_b=tile_b, pad=self.pad, b_pad=b_pad,
            d_in=din, d_embed=self.enc_channels[-1],
            d_out=self.dec_channels[-1], batch=B)

        if return_embed:
            return embed, out
        return out


def _reference_forward(model, x, return_embed=False):
    """Plain-JAX reference with the same precision policy (bf16 MXU, f32 accum)."""
    h = x.astype(jnp.float32)
    embed = None
    for idx, (w_t, b) in enumerate(model.params_f32):
        y = jnp.dot(h.astype(jnp.bfloat16), w_t.astype(jnp.bfloat16),
                    preferred_element_type=jnp.float32)
        h = jnp.maximum(y + b, 0.0)
        if idx == model.n_enc - 1:
            embed = h
    if return_embed:
        return embed, h
    return h


if __name__ == "__main__":
    key = jax.random.PRNGKey(0)
    k_params, k_x = jax.random.split(key)

    enc_channels = (32, 16, 8)
    dec_channels = (8, 16, 32)
    batch = 8

    model = BaseAutoencoderPallas(enc_channels, dec_channels, k_params)
    x = jax.random.normal(k_x, (batch, enc_channels[0]), jnp.float32)

    embed, out = model(x, return_embed=True)
    out = jax.block_until_ready(out)
    embed = jax.block_until_ready(embed)

    assert out.shape == (batch, dec_channels[-1])
    assert embed.shape == (batch, enc_channels[-1])

    ref_embed, ref_out = _reference_forward(model, x, return_embed=True)
    assert jnp.allclose(out, ref_out, atol=1e-3, rtol=1e-3), "output mismatch vs reference"
    assert jnp.allclose(embed, ref_embed, atol=1e-3, rtol=1e-3), "embed mismatch vs reference"

    print("KERNEL_OK")
</pallas_src>

<mosaic_0001>
module attributes {stable_mosaic.version = 11 : i64} {
  func.func @_fused_ae_kernel(%arg0: i32, %arg1: memref<8x128xbf16, #tpu.memory_space<vmem>>, %arg2: memref<4x128x128xbf16, #tpu.memory_space<vmem>>, %arg3: memref<4x1x128xf32, #tpu.memory_space<vmem>>, %arg4: memref<8x128xf32, #tpu.memory_space<vmem>>, %arg5: memref<8x128xf32, #tpu.memory_space<vmem>>) attributes {dimension_semantics = [#tpu.dimension_semantics<parallel>], iteration_bounds = array<i64: 1>, scalar_prefetch = 0 : i64, scratch_operands = 0 : i64, tpu.core_type = #tpu.core_type<tc>, window_params = [{transform_indices = @transform_0, window_bounds = array<i64: 8, 128>}, {pipeline_mode = #tpu.pipeline_mode<synchronous>, transform_indices = @transform_1, window_bounds = array<i64: 4, 128, 128>}, {pipeline_mode = #tpu.pipeline_mode<synchronous>, transform_indices = @transform_2, window_bounds = array<i64: 4, 1, 128>}, {transform_indices = @transform_3, window_bounds = array<i64: 8, 128>}, {transform_indices = @transform_4, window_bounds = array<i64: 8, 128>}]} {
    %c0 = arith.constant 0 : index
    %c0_0 = arith.constant 0 : index
    %0 = vector.load %arg1[%c0, %c0_0] : memref<8x128xbf16, #tpu.memory_space<vmem>>, vector<8x128xbf16>
    %c0_1 = arith.constant 0 : index
    %c0_2 = arith.constant 0 : index
    %c0_3 = arith.constant 0 : index
    %1 = vector.load %arg2[%c0_1, %c0_2, %c0_3] : memref<4x128x128xbf16, #tpu.memory_space<vmem>>, vector<1x128x128xbf16>
    %2 = vector.shape_cast %1 : vector<1x128x128xbf16> to vector<128x128xbf16>
    %cst = arith.constant dense<0.000000e+00> : vector<8x128xf32>
    %3 = tpu.matmul %0, %2, %cst {dimension_numbers = #tpu.dot_dimension_numbers<[1], [0], [0], [1], [0, 0, 1, 1], [], []>} : vector<8x128xbf16>, vector<128x128xbf16>, vector<8x128xf32> -> vector<8x128xf32>
    %c0_4 = arith.constant 0 : index
    %c0_5 = arith.constant 0 : index
    %c0_6 = arith.constant 0 : index
    %4 = vector.load %arg3[%c0_4, %c0_5, %c0_6] : memref<4x1x128xf32, #tpu.memory_space<vmem>>, vector<1x1x128xf32>
    %5 = vector.shape_cast %4 : vector<1x1x128xf32> to vector<1x128xf32>
    %6 = vector.broadcast %5 : vector<1x128xf32> to vector<8x128xf32>
    %7 = arith.addf %3, %6 : vector<8x128xf32>
    %cst_7 = arith.constant 0.000000e+00 : f32
    %8 = vector.broadcast %cst_7 : f32 to vector<8x128xf32>
    %9 = arith.maximumf %7, %8 : vector<8x128xf32>
    %10 = arith.truncf %9 : vector<8x128xf32> to vector<8x128xbf16>
    %c1 = arith.constant 1 : index
    %c0_8 = arith.constant 0 : index
    %c0_9 = arith.constant 0 : index
    %11 = vector.load %arg2[%c1, %c0_8, %c0_9] : memref<4x128x128xbf16, #tpu.memory_space<vmem>>, vector<1x128x128xbf16>
    %12 = vector.shape_cast %11 : vector<1x128x128xbf16> to vector<128x128xbf16>
    %cst_10 = arith.constant dense<0.000000e+00> : vector<8x128xf32>
    %13 = tpu.matmul %10, %12, %cst_10 {dimension_numbers = #tpu.dot_dimension_numbers<[1], [0], [0], [1], [0, 0, 1, 1], [], []>} : vector<8x128xbf16>, vector<128x128xbf16>, vector<8x128xf32> -> vector<8x128xf32>
    %c1_11 = arith.constant 1 : index
    %c0_12 = arith.constant 0 : index
    %c0_13 = arith.constant 0 : index
    %14 = vector.load %arg3[%c1_11, %c0_12, %c0_13] : memref<4x1x128xf32, #tpu.memory_space<vmem>>, vector<1x1x128xf32>
    %15 = vector.shape_cast %14 : vector<1x1x128xf32> to vector<1x128xf32>
    %16 = vector.broadcast %15 : vector<1x128xf32> to vector<8x128xf32>
    %17 = arith.addf %13, %16 : vector<8x128xf32>
    %cst_14 = arith.constant 0.000000e+00 : f32
    %18 = vector.broadcast %cst_14 : f32 to vector<8x128xf32>
    %19 = arith.maximumf %17, %18 : vector<8x128xf32>
    %c0_15 = arith.constant 0 : index
    %c0_16 = arith.constant 0 : index
    %20 = vector.load %arg4[%c0_15, %c0_16] : memref<8x128xf32, #tpu.memory_space<vmem>>, vector<8x128xf32>
    tpu.vector_store %arg4[%c0_15, %c0_16], %19 {strides = array<i32>} : memref<8x128xf32, #tpu.memory_space<vmem>>, vector<8x128xf32>,
    %21 = arith.truncf %19 : vector<8x128xf32> to vector<8x128xbf16>
    %c2 = arith.constant 2 : index
    %c0_17 = arith.constant 0 : index
    %c0_18 = arith.constant 0 : index
    %22 = vector.load %arg2[%c2, %c0_17, %c0_18] : memref<4x128x128xbf16, #tpu.memory_space<vmem>>, vector<1x128x128xbf16>
    %23 = vector.shape_cast %22 : vector<1x128x128xbf16> to vector<128x128xbf16>
    %cst_19 = arith.constant dense<0.000000e+00> : vector<8x128xf32>
    %24 = tpu.matmul %21, %23, %cst_19 {dimension_numbers = #tpu.dot_dimension_numbers<[1], [0], [0], [1], [0, 0, 1, 1], [], []>} : vector<8x128xbf16>, vector<128x128xbf16>, vector<8x128xf32> -> vector<8x128xf32>
    %c2_20 = arith.constant 2 : index
    %c0_21 = arith.constant 0 : index
    %c0_22 = arith.constant 0 : index
    %25 = vector.load %arg3[%c2_20, %c0_21, %c0_22] : memref<4x1x128xf32, #tpu.memory_space<vmem>>, vector<1x1x128xf32>
    %26 = vector.shape_cast %25 : vector<1x1x128xf32> to vector<1x128xf32>
    %27 = vector.broadcast %26 : vector<1x128xf32> to vector<8x128xf32>
    %28 = arith.addf %24, %27 : vector<8x128xf32>
    %cst_23 = arith.constant 0.000000e+00 : f32
    %29 = vector.broadcast %cst_23 : f32 to vector<8x128xf32>
    %30 = arith.maximumf %28, %29 : vector<8x128xf32>
    %31 = arith.truncf %30 : vector<8x128xf32> to vector<8x128xbf16>
    %c3 = arith.constant 3 : index
    %c0_24 = arith.constant 0 : index
    %c0_25 = arith.constant 0 : index
    %32 = vector.load %arg2[%c3, %c0_24, %c0_25] : memref<4x128x128xbf16, #tpu.memory_space<vmem>>, vector<1x128x128xbf16>
    %33 = vector.shape_cast %32 : vector<1x128x128xbf16> to vector<128x128xbf16>
    %cst_26 = arith.constant dense<0.000000e+00> : vector<8x128xf32>
    %34 = tpu.matmul %31, %33, %cst_26 {dimension_numbers = #tpu.dot_dimension_numbers<[1], [0], [0], [1], [0, 0, 1, 1], [], []>} : vector<8x128xbf16>, vector<128x128xbf16>, vector<8x128xf32> -> vector<8x128xf32>
    %c3_27 = arith.constant 3 : index
    %c0_28 = arith.constant 0 : index
    %c0_29 = arith.constant 0 : index
    %35 = vector.load %arg3[%c3_27, %c0_28, %c0_29] : memref<4x1x128xf32, #tpu.memory_space<vmem>>, vector<1x1x128xf32>
    %36 = vector.shape_cast %35 : vector<1x1x128xf32> to vector<1x128xf32>
    %37 = vector.broadcast %36 : vector<1x128xf32> to vector<8x128xf32>
    %38 = arith.addf %34, %37 : vector<8x128xf32>
    %cst_30 = arith.constant 0.000000e+00 : f32
    %39 = vector.broadcast %cst_30 : f32 to vector<8x128xf32>
    %40 = arith.maximumf %38, %39 : vector<8x128xf32>
    %c0_31 = arith.constant 0 : index
    %c0_32 = arith.constant 0 : index
    %41 = vector.load %arg5[%c0_31, %c0_32] : memref<8x128xf32, #tpu.memory_space<vmem>>, vector<8x128xf32>
    tpu.vector_store %arg5[%c0_31, %c0_32], %40 {strides = array<i32>} : memref<8x128xf32, #tpu.memory_space<vmem>>, vector<8x128xf32>,
    return
  }
  func.func @transform_0(%arg0: i32) -> (i32, i32) {
    %c0_i32 = arith.constant 0 : i32
    %c0_i32_0 = arith.constant 0 : i32
    return %arg0, %c0_i32 : i32, i32
  }
  func.func @transform_1(%arg0: i32) -> (i32, i32, i32) {
    %c0_i32 = arith.constant 0 : i32
    %c0_i32_0 = arith.constant 0 : i32
    %c0_i32_1 = arith.constant 0 : i32
    %c0_i32_2 = arith.constant 0 : i32
    return %c0_i32, %c0_i32_0, %c0_i32_1 : i32, i32, i32
  }
  func.func @transform_2(%arg0: i32) -> (i32, i32, i32) {
    %c0_i32 = arith.constant 0 : i32
    %c0_i32_0 = arith.constant 0 : i32
    %c0_i32_1 = arith.constant 0 : i32
    %c0_i32_2 = arith.constant 0 : i32
    return %c0_i32, %c0_i32_0, %c0_i32_1 : i32, i32, i32
  }
  func.func @transform_3(%arg0: i32) -> (i32, i32) {
    %c0_i32 = arith.constant 0 : i32
    %c0_i32_0 = arith.constant 0 : i32
    return %arg0, %c0_i32 : i32, i32
  }
  func.func @transform_4(%arg0: i32) -> (i32, i32) {
    %c0_i32 = arith.constant 0 : i32
    %c0_i32_0 = arith.constant 0 : i32
    return %arg0, %c0_i32 : i32, i32
  }
}

</mosaic_0001>

<bundles_post_ra>
// kernel: _forward_padded.1
= control target key start
LH: loop header
LB: loop body
LE: loop exit
PB: predicated region body
PF: predicated region fallthrough
CT: control target
= control target key end

     0   :  { %10 = vsyncpa [#allocation3], 0  ;;  %s911_s0 = inlined_call_operand.vmem [shape: bf16[8,128], index: 0, kind: input, shape index: {}]   ;;  %s912_s1 = inlined_call_operand.hbm [shape: bf16[4,128,128], index: 1, kind: input, shape index: {}]   ;;  %s913_s2 = inlined_call_operand.vmem [shape: f32[4,1,128], index: 2, kind: input, shape index: {}]   ;;  %s914_s3 = inlined_call_operand.hbm [shape: f32[8,128], index: 3, kind: output, shape index: {0}]   ;;  %s915_s4 = inlined_call_operand.hbm [shape: f32[8,128], index: 4, kind: output, shape index: {1}]  }
   0x1   :  { %11 = vsyncpa [#allocation4], 0 }
   0x2   :  { %12 = vsyncpa [#allocation7], 0  ;;  %s788_s15 = smov [#allocation2]   ;;  %s716_s19 = scalar_lea.hbm %s912_s1, 4096 }
   0x3   :  { %s20_s16 = sshll.u32 %s788_s15, 4  ;;  %p717_p0 = scmp.ne.s32.totalorder %s912_s1, %s716_s19  ;;  %s21_s16 = int_to_ptr.vmem [resolvable:$true] %s20_s16 }
   0x4   :  { %p720_p1 = scmp.lt.u32.totalorder %s716_s19, %s912_s1 }
   0x6   :  { %p722_p2 = pnand %p720_p1, %p717_p0 }
   0x8   :  { %725 = shalt.err (!%p722_p2)
}
   0x9   :  { %s726_s24 = scalar_lea.vmem %s21_s16, 4096  ;;  %p731_p4 = scmp.lt.s32.totalorder %s21_s16, %s21_s16 }
   0xa   :  { %p727_p3 = scmp.ne.s32.totalorder %s21_s16, %s726_s24  ;;  %p732_p5 = scmp.lt.s32.totalorder %s726_s24, %s726_s24 }
   0xc   :  { %p733_p6 = por %p732_p5, %p731_p4 }
   0xe   :  { %p734_p7 = pnand %p733_p6, %p727_p3 }
  0x10   :  { %737 = shalt.err (!%p734_p7)
}
  0x11   :  { %s789_s25 = smov 64   ;;  %s790_s26 = smov 4  }
  0x12   :  { %26 = dma.hbm_to_vmem [thread:$0]  %s912_s1, 4096, %s21_s16, [#allocation3], %s789_s25, %s789_s25, %s790_s26  }
  0x13   :  { %782 = dma.done.wait [#allocation3], 4096  }
  0x14   :  { %783 = vsyncadd [#allocation3], 4294963200  ;;  %v791_v0 = vmov 0.0   ;;  %vm792_vm0 = vmmov 0   ;;  %v684_v1 = vld [vmem:[#allocation2] sm:$0xff]   ;;  %v685_v2 = vld [vmem:[#allocation2 + $0x8] sm:$0xff]  }
  0x15   :  { %597 = vmatprep.subr.bf16.mxu0 %v791_v0  ;;  %613 = vmatprep.mubr.msk.bf16.mxu0 %vm792_vm0, %v791_v0  ;;  %v686_v3 = vld [vmem:[#allocation2 + $0x10] sm:$0xff]   ;;  %v692_v4 = vld [vmem:[#allocation2 + $0x40] sm:$0xff]   ;;  %v687_v5 = vld [vmem:[#allocation2 + $0x18] sm:$0xff]   ;;  %s793_s9 = smov [#allocation5]  }
  0x16   :  { %617 = vmatprep.subr.bf16.mxu1 %v791_v0  ;;  %633 = vmatprep.mubr.msk.bf16.mxu1 %vm792_vm0, %v791_v0  ;;  %v693_v6 = vld [vmem:[#allocation2 + $0x48] sm:$0xff]   ;;  %v688_v7 = vld [vmem:[#allocation2 + $0x20] sm:$0xff]   ;;  %v694_v8 = vld [vmem:[#allocation2 + $0x50] sm:$0xff]   ;;  %s499_s10 = sshll.u32 %s793_s9, 4  ;;  %s500_s10 = int_to_ptr.vmem [resolvable:$true] %s499_s10 }
  0x17   :  { %598 = vmatpush3.bf16.msra.mxu0 %v684_v1  ;;  %618 = vmatpush3.bf16.msra.mxu1 %v692_v4  ;;  %v689_v9 = vld [vmem:[#allocation2 + $0x28] sm:$0xff]   ;;  %v695_v10 = vld [vmem:[#allocation2 + $0x58] sm:$0xff]   ;;  %v690_v11 = vld [vmem:[#allocation2 + $0x30] sm:$0xff]   ;;  %s738_s11 = scalar_lea.vmem %s500_s10, 128  ;;  %p743_p9 = scmp.lt.s32.totalorder %s500_s10, %s500_s10 }
  0x18   :  { %599 = vmatprep.subr.bf16.mxu0 %v791_v0  ;;  %619 = vmatprep.subr.bf16.mxu1 %v791_v0  ;;  %v696_v12 = vld [vmem:[#allocation2 + $0x60] sm:$0xff]   ;;  %v691_v13 = vld [vmem:[#allocation2 + $0x38] sm:$0xff]   ;;  %v697_v14 = vld [vmem:[#allocation2 + $0x68] sm:$0xff]   ;;  %p739_p8 = scmp.ne.s32.totalorder %s500_s10, %s738_s11  ;;  %p744_p10 = scmp.lt.s32.totalorder %s738_s11, %s738_s11 }
  0x19   :  { %v33_v15 = vld [vmem:[%s911_s0] sm:$0xf]  ;;  %v698_v16 = vld [vmem:[#allocation2 + $0x70] sm:$0xff]   ;;  %v699_v17 = vld [vmem:[#allocation2 + $0x78] sm:$0xff]  }
  0x1a   :  { %v700_v18 = vld [vmem:[#allocation2 + $0x80] sm:$0xff]   ;;  %v701_v19 = vld [vmem:[#allocation2 + $0x88] sm:$0xff]   ;;  %v702_v20 = vld [vmem:[#allocation2 + $0x90] sm:$0xff]   ;;  %p745_p11 = por %p744_p10, %p743_p9 }
  0x1b   :  { %600 = vmatpush3.bf16.msra.mxu0 %v685_v2  ;;  %620 = vmatpush3.bf16.msra.mxu1 %v693_v6  ;;  %v703_v21 = vld [vmem:[#allocation2 + $0x98] sm:$0xff]   ;;  %v704_v22 = vld [vmem:[#allocation2 + $0xa0] sm:$0xff]   ;;  %v705_v23 = vld [vmem:[#allocation2 + $0xa8] sm:$0xff]  }
  0x1c   :  { %601 = vmatprep.subr.bf16.mxu0 %v791_v0  ;;  %621 = vmatprep.subr.bf16.mxu1 %v791_v0  ;;  %v522_v24 = vld [vmem:[%s913_s2] ss:$0 sm:$0xff]  ;;  %v706_v32 = vld [vmem:[#allocation2 + $0xb0] sm:$0xff]   ;;  %v707_v33 = vld [vmem:[#allocation2 + $0xb8] sm:$0xff]   ;;  %p746_p12 = pnand %p745_p11, %p739_p8 }
  0x1d   :  { %v708_v34 = vld [vmem:[#allocation2 + $0xc0] sm:$0xff]   ;;  %v709_v35 = vld [vmem:[#allocation2 + $0xc8] sm:$0xff]   ;;  %v710_v36 = vld [vmem:[#allocation2 + $0xd0] sm:$0xff]  }
  0x1e   :  { %v711_v37 = vld [vmem:[#allocation2 + $0xd8] sm:$0xff]   ;;  %v712_v38 = vld [vmem:[#allocation2 + $0xe0] sm:$0xff]   ;;  %v713_v39 = vld [vmem:[#allocation2 + $0xe8] sm:$0xff]  }
  0x1f   :  { %602 = vmatpush3.bf16.msra.mxu0 %v686_v3  ;;  %622 = vmatpush3.bf16.msra.mxu1 %v694_v8  ;;  %v532_v40 = vld [vmem:[%s913_s2 + $0x1] ss:$0 sm:$0xff]  ;;  %v714_v48 = vld [vmem:[#allocation2 + $0xf0] sm:$0xff]   ;;  %v715_v49 = vld [vmem:[#allocation2 + $0xf8] sm:$0xff]  }
  0x20   :  { %603 = vmatprep.subr.bf16.mxu0 %v791_v0  ;;  %623 = vmatprep.subr.bf16.mxu1 %v791_v0  ;;  %v542_v50 = vld [vmem:[%s913_s2 + $0x2] ss:$0 sm:$0xff] }
  0x23   :  { %604 = vmatpush3.bf16.msra.mxu0 %v687_v5  ;;  %624 = vmatpush3.bf16.msra.mxu1 %v695_v10 }
  0x24   :  { %605 = vmatprep.subr.bf16.mxu0 %v791_v0  ;;  %625 = vmatprep.subr.bf16.mxu1 %v791_v0 }
  0x27   :  { %606 = vmatpush3.bf16.msra.mxu0 %v688_v7  ;;  %626 = vmatpush3.bf16.msra.mxu1 %v696_v12 }
  0x28   :  { %607 = vmatprep.subr.bf16.mxu0 %v791_v0  ;;  %627 = vmatprep.subr.bf16.mxu1 %v791_v0 }
  0x2b   :  { %608 = vmatpush3.bf16.msra.mxu0 %v689_v9  ;;  %628 = vmatpush3.bf16.msra.mxu1 %v697_v14 }
  0x2c   :  { %609 = vmatprep.subr.bf16.mxu0 %v791_v0  ;;  %629 = vmatprep.subr.bf16.mxu1 %v791_v0 }
  0x2f   :  { %610 = vmatpush3.bf16.msra.mxu0 %v690_v11  ;;  %630 = vmatpush3.bf16.msra.mxu1 %v698_v16 }
  0x30   :  { %611 = vmatprep.subr.bf16.mxu0 %v791_v0  ;;  %631 = vmatprep.subr.bf16.mxu1 %v791_v0 }
  0x33   :  { %612 = vmatpush3.bf16.msra.mxu0 %v691_v13  ;;  %632 = vmatpush3.bf16.msra.mxu1 %v699_v17 }
  0x34   :  { %637 = vmatprep.subr.bf16.mxu0 %v791_v0  ;;  %657 = vmatprep.subr.bf16.mxu1 %v791_v0 }
  0x36   :  { %614 = vmatmul.mubr.bf16.vlgmr.msra.gmra.mrb[0].mxu0 %v33_v15 }
  0x37   :  { %653 = vmatprep.mubr.msk.bf16.mxu0 %vm792_vm0, %v791_v0  ;;  %638 = vmatpush3.bf16.msra.mxu0 %v700_v18 }
  0x38   :  { %639 = vmatprep.subr.bf16.mxu0 %v791_v0 }
  0x3b   :  { %640 = vmatpush3.bf16.msra.mxu0 %v701_v19 }
  0x3c   :  { %641 = vmatprep.subr.bf16.mxu0 %v791_v0 }
  0x3f   :  { %642 = vmatpush3.bf16.msra.mxu0 %v702_v20 }
  0x40   :  { %643 = vmatprep.subr.bf16.mxu0 %v791_v0 }
  0x43   :  { %644 = vmatpush3.bf16.msra.mxu0 %v703_v21 }
  0x44   :  { %645 = vmatprep.subr.bf16.mxu0 %v791_v0 }
  0x47   :  { %646 = vmatpush3.bf16.msra.mxu0 %v704_v22 }
  0x48   :  { %647 = vmatprep.subr.bf16.mxu0 %v791_v0 }
  0x4b   :  { %648 = vmatpush3.bf16.msra.mxu0 %v705_v23 }
  0x4c   :  { %649 = vmatprep.subr.bf16.mxu0 %v791_v0 }
  0x4f   :  { %650 = vmatpush3.bf16.msra.mxu0 %v706_v32 }
  0x50   :  { %651 = vmatprep.subr.bf16.mxu0 %v791_v0 }
  0x53   :  { %652 = vmatpush3.bf16.msra.mxu0 %v707_v33 }
 0x109   :  { %v139_v25 = vpop.f32.mrb[0].mxu0 }
 0x10a   :  { %v140_v26 = vadd.f32 %v522_v24, %v139_v25  ;;  %v615_v27 = vpop.f32.mrb[1].mxu0 }
 0x10b   :  { %v142_v28 = vpop.f32.mrb[2].mxu0 }
 0x10c   :  { %v145_v29 = vmax.f32 %v140_v26, 0.0  ;;  %v616_v30 = vpop.f32.mrb[3].mxu0 }
 0x10e   :  { %v146_v31 = vpack.c.bf16 %v145_v29, %v145_v29 }
 0x110   :  { %634 = vmatmul.mubr.bf16.vlgmr.msra.gmra.mrb[0].mxu1 %v146_v31 }
 0x111   :  { %673 = vmatprep.mubr.msk.bf16.mxu1 %vm792_vm0, %v791_v0  ;;  %658 = vmatpush3.bf16.msra.mxu1 %v708_v34 }
 0x112   :  { %659 = vmatprep.subr.bf16.mxu1 %v791_v0 }
 0x115   :  { %660 = vmatpush3.bf16.msra.mxu1 %v709_v35 }
 0x116   :  { %661 = vmatprep.subr.bf16.mxu1 %v791_v0 }
 0x119   :  { %662 = vmatpush3.bf16.msra.mxu1 %v710_v36 }
 0x11a   :  { %663 = vmatprep.subr.bf16.mxu1 %v791_v0 }
 0x11d   :  { %664 = vmatpush3.bf16.msra.mxu1 %v711_v37 }
 0x11e   :  { %665 = vmatprep.subr.bf16.mxu1 %v791_v0 }
 0x121   :  { %666 = vmatpush3.bf16.msra.mxu1 %v712_v38 }
 0x122   :  { %667 = vmatprep.subr.bf16.mxu1 %v791_v0 }
 0x125   :  { %668 = vmatpush3.bf16.msra.mxu1 %v713_v39 }
 0x126   :  { %669 = vmatprep.subr.bf16.mxu1 %v791_v0 }
 0x129   :  { %670 = vmatpush3.bf16.msra.mxu1 %v714_v48 }
 0x12a   :  { %671 = vmatprep.subr.bf16.mxu1 %v791_v0 }
 0x12d   :  { %672 = vmatpush3.bf16.msra.mxu1 %v715_v49 }
 0x1e3   :  { %v254_v41 = vpop.f32.mrb[0].mxu1 }
 0x1e4   :  { %v255_v42 = vadd.f32 %v532_v40, %v254_v41  ;;  %v635_v43 = vpop.f32.mrb[1].mxu1 }
 0x1e5   :  { %v257_v44 = vpop.f32.mrb[2].mxu1 }
 0x1e6   :  { %v260_v45 = vmax.f32 %v255_v42, 0.0  ;;  %v636_v46 = vpop.f32.mrb[3].mxu1 }
 0x1e8   :  { %v262_v47 = vpack.c.bf16 %v260_v45, %v260_v45  ;;  %261 = vst [vmem:[#allocation5] sm:$0xff] %v260_v45 }
 0x1ea   :  { %654 = vmatmul.mubr.bf16.vlgmr.msra.gmra.mrb[4].mxu0 %v262_v47 }
 0x2bd   :  { %v370_v51 = vpop.f32.mrb[4].mxu0 }
 0x2be   :  { %v371_v52 = vadd.f32 %v542_v50, %v370_v51  ;;  %v655_v53 = vpop.f32.mrb[5].mxu0 }
 0x2bf   :  { %v373_v54 = vpop.f32.mrb[6].mxu0 }
 0x2c0   :  { %v376_v55 = vmax.f32 %v371_v52, 0.0  ;;  %v656_v56 = vpop.f32.mrb[7].mxu0 }
 0x2c2   :  { %v377_v57 = vpack.c.bf16 %v376_v55, %v376_v55 }
 0x2c4   :  { %674 = vmatmul.mubr.bf16.vlgmr.msra.gmra.mrb[4].mxu1 %v377_v57 }
 0x2c5   :  { %749 = shalt.err (!%p746_p12)
}
 0x2c6   :  { %s750_s14 = scalar_lea.hbm %s914_s3, 128 }
 0x2c7   :  { %p751_p13 = scmp.ne.s32.totalorder %s914_s3, %s750_s14  ;;  %p754_p0 = scmp.lt.u32.totalorder %s750_s14, %s914_s3 }
 0x2c9   :  { %p756_p1 = pnand %p754_p0, %p751_p13 }
 0x2cb   :  { %759 = shalt.err (!%p756_p1)
}
 0x2cc   :  { %502 = dma.vmem_to_hbm [thread:$0]  %s500_s10, 128, %s914_s3, [#allocation4]   ;;  %v552_v58 = vld [vmem:[%s913_s2 + $0x3] ss:$0 sm:$0xff] }
 0x2cd   :  { %s794_s23 = smov [#allocation6]  }
 0x2ce   :  { %s509_s24 = sshll.u32 %s794_s23, 4  ;;  %s510_s24 = int_to_ptr.vmem [resolvable:$true] %s509_s24 }
 0x2cf   :  { %s760_s25 = scalar_lea.vmem %s510_s24, 128  ;;  %p765_p3 = scmp.lt.s32.totalorder %s510_s24, %s510_s24 }
 0x2d0   :  { %p761_p2 = scmp.ne.s32.totalorder %s510_s24, %s760_s25  ;;  %p766_p4 = scmp.lt.s32.totalorder %s760_s25, %s760_s25 }
 0x2d2   :  { %p767_p5 = por %p766_p4, %p765_p3 }
 0x2d4   :  { %p768_p6 = pnand %p767_p5, %p761_p2 }
 0x397   :  { %v485_v59 = vpop.f32.mrb[4].mxu1 }
 0x398   :  { %v486_v60 = vadd.f32 %v552_v58, %v485_v59  ;;  %v675_v61 = vpop.f32.mrb[5].mxu1 }
 0x399   :  { %v488_v62 = vpop.f32.mrb[6].mxu1 }
 0x39a   :  { %v491_v63 = vmax.f32 %v486_v60, 0.0  ;;  %v676_v0 = vpop.f32.mrb[7].mxu1 }
 0x39c   :  { %492 = vst [vmem:[#allocation6] sm:$0xff] %v491_v63 }
 0x39d   :  { %771 = shalt.err (!%p768_p6)
}
 0x39e   :  { %s772_s2 = scalar_lea.hbm %s915_s4, 128 }
 0x39f   :  { %p773_p7 = scmp.ne.s32.totalorder %s915_s4, %s772_s2  ;;  %p776_p8 = scmp.lt.u32.totalorder %s772_s2, %s915_s4 }
 0x3a1   :  { %p778_p9 = pnand %p776_p8, %p773_p7 }
 0x3a3   :  { %781 = shalt.err (!%p778_p9)
}
 0x3a4   :  { %512 = dma.vmem_to_hbm [thread:$0]  %s510_s24, 128, %s915_s4, [#allocation7]  }
 0x3a5   :  { %784 = dma.done.wait [#allocation4], 128  }
 0x3a6   :  { %785 = vsyncadd [#allocation4], 4294967168 }
 0x3a7   :  { %786 = dma.done.wait [#allocation7], 128  }
 0x3a8   :  { %787 = vsyncadd [#allocation7], 4294967168 }
 0x3a9   :  { %519 = vsyncpa [#allocation3], 1 }
 0x3aa   :  { %520 = vsyncpa [#allocation4], 1 }
 0x3ab   :  { %521 = vsyncpa [#allocation7], 1 }

</bundles_post_ra>
